<compile_context>
chip_gen: v6e
topology: v6e:2x2x1
jax: 0.10.0
libtpu: 0.0.40
codegen_flags: <defaults>
</compile_context>

<pallas_src>
import math
import functools

import jax
import jax.numpy as jnp
from jax import lax
from jax.experimental import pallas as pl
from jax.experimental.pallas import tpu as pltpu


def _round_up(x: int, m: int) -> int:
    return ((x + m - 1) // m) * m


def temporal_encoding_kernel(idx_ref, tab_ref, out_ref, *, k_pe, k_small):
    """Fused 4-way embedding gather + sum as one multi-hot @ table matmul.

    idx_ref : (tile_n, 4) int32
              col 0: hour          in [0, 24)   -> small block lane
              col 1: day   + 24    in [24, 31)  -> small block lane
              col 2: month + 31    in [31, 43)  -> small block lane
              col 3: days % P      in [0, k_pe) -> PE block lane
    tab_ref : (k_pe + k_small, E)  combined table [PE | hour|day|month | pad]
    out_ref : (tile_n, E) float32
    """
    idx = idx_ref[...]                                    # (tile_n, 4)
    tile_n = idx_ref.shape[0]

    # PE one-hot: compare only over the first k_pe lanes (3x128 for P=365).
    iota_pe = lax.broadcasted_iota(jnp.int32, (tile_n, k_pe), 1)
    pe_hit = idx[:, 3:4] == iota_pe                       # (tile_n, k_pe) bool

    # hour/day/month multi-hot: compare only over one 128-lane block.
    iota_s = lax.broadcasted_iota(jnp.int32, (tile_n, k_small), 1)
    s_hit = idx[:, 0:1] == iota_s
    s_hit = s_hit | (idx[:, 1:2] == iota_s)
    s_hit = s_hit | (idx[:, 2:3] == iota_s)               # (tile_n, k_small)

    # Disjoint lane ranges -> exactly four ones per row.  Concat boundary at
    # k_pe (a multiple of 128) so no lane relayout; single cast per piece.
    multihot = jnp.concatenate(
        [pe_hit.astype(tab_ref.dtype), s_hit.astype(tab_ref.dtype)], axis=-1)

    # One MXU matmul computes hour_emb + day_emb + month_emb + pe, f32 accum.
    out_ref[...] = jnp.dot(
        multihot, tab_ref[...], preferred_element_type=jnp.float32
    ).astype(out_ref.dtype)


def make_sinusoidal_pe(max_period: int, embed_dim: int) -> jnp.ndarray:
    position = jnp.arange(max_period, dtype=jnp.float32)[:, None]            # (P, 1)
    div_term = jnp.exp(jnp.arange(0, embed_dim, 2, dtype=jnp.float32)
                       * (-math.log(10000.0) / embed_dim))                   # (E/2,)
    pe = jnp.zeros((max_period, embed_dim), dtype=jnp.float32)
    pe = pe.at[:, 0::2].set(jnp.sin(position * div_term))
    pe = pe.at[:, 1::2].set(jnp.cos(position * div_term))
    return pe


def temporal_encoding(hour, day, month, days_since,
                      hour_tab, day_tab, month_tab, pe,
                      *, tile_n: int = 1024, compute_dtype=jnp.bfloat16):
    """hour/day/month/days_since: int [B, T].  Returns float32 [B, T, E]."""
    assert hour.shape == day.shape == month.shape == days_since.shape
    B, T = hour.shape
    E = hour_tab.shape[1]
    max_period = pe.shape[0]
    N = B * T

    # ---- combined table (plain JAX, wrapper side) --------------------------
    k_pe = _round_up(max_period, 128)          # 365 -> 384 (PE block, lane-aligned)
    k_small = 128                              # hour|day|month block
    k_pad = k_pe + k_small                     # 512

    off_hour = k_pe
    off_day = k_pe + 24
    off_month = k_pe + 31

    table = jnp.zeros((k_pad, E), dtype=compute_dtype)
    table = table.at[:max_period].set(pe.astype(compute_dtype))
    table = table.at[off_hour:off_hour + 24].set(hour_tab.astype(compute_dtype))
    table = table.at[off_day:off_day + 7].set(day_tab.astype(compute_dtype))
    table = table.at[off_month:off_month + 12].set(month_tab.astype(compute_dtype))

    # ---- packed, pre-offset indices (modulo done here, not in-kernel) ------
    idx = jnp.stack(
        [
            hour.reshape(-1).astype(jnp.int32),                     # -> small lane [0,24)
            day.reshape(-1).astype(jnp.int32) + 24,                 # -> small lane [24,31)
            month.reshape(-1).astype(jnp.int32) + 31,               # -> small lane [31,43)
            days_since.reshape(-1).astype(jnp.int32) % max_period,  # -> PE lane [0,P)
        ],
        axis=-1,
    )                                                                # (N, 4)

    # Large rows-per-step tile, but keep >= 2 grid steps for large N so both
    # v7x TensorCores get work on the "parallel" axis; clamp for tiny N.
    tile_n = max(8, min(tile_n, _round_up(pl.cdiv(N, 2), 8)))
    n_pad = _round_up(N, tile_n)
    idx = jnp.pad(idx, ((0, n_pad - N), (0, 0)))   # padded rows sliced off below

    grid = (n_pad // tile_n,)

    kernel = functools.partial(temporal_encoding_kernel, k_pe=k_pe, k_small=k_small)

    itemsize = jnp.dtype(compute_dtype).itemsize
    cost = pl.CostEstimate(
        flops=2 * n_pad * k_pad * E,
        transcendentals=0,
        bytes_accessed=idx.size * 4 + k_pad * E * itemsize + n_pad * E * 4,
    )

    out = pl.pallas_call(
        kernel,
        out_shape=jax.ShapeDtypeStruct((n_pad, E), jnp.float32),
        grid_spec=pltpu.PrefetchScalarGridSpec(
            num_scalar_prefetch=0,
            grid=grid,
            in_specs=[
                pl.BlockSpec((tile_n, 4), lambda i: (i, 0)),   # packed indices
                pl.BlockSpec((k_pad, E), lambda i: (0, 0)),    # table, VMEM-resident
            ],
            out_specs=pl.BlockSpec((tile_n, E), lambda i: (i, 0)),
        ),
        compiler_params=pltpu.CompilerParams(
            dimension_semantics=("parallel",)),
        cost_estimate=cost,
    )(idx, table)

    return out[:N].reshape(B, T, E)


def reference(hour, day, month, days_since, hour_tab, day_tab, month_tab, pe):
    max_period = pe.shape[0]
    temporal = hour_tab[hour] + day_tab[day] + month_tab[month]
    seasonal = pe[days_since % max_period]
    return temporal + seasonal


if __name__ == "__main__":
    key = jax.random.PRNGKey(0)
    B, T, E, MAX_PERIOD = 2, 8, 32, 365

    k1, k2, k3, k4, k5, k6, k7 = jax.random.split(key, 7)

    # deterministic parameter init (nn.Embedding default: N(0, 1))
    hour_tab = jax.random.normal(k1, (24, E), dtype=jnp.float32)
    day_tab = jax.random.normal(k2, (7, E), dtype=jnp.float32)
    month_tab = jax.random.normal(k3, (12, E), dtype=jnp.float32)
    pe = make_sinusoidal_pe(MAX_PERIOD, E)

    hour = jax.random.randint(k4, (B, T), 0, 24, dtype=jnp.int32)
    day = jax.random.randint(k5, (B, T), 0, 7, dtype=jnp.int32)
    month = jax.random.randint(k6, (B, T), 0, 12, dtype=jnp.int32)
    days_since = jax.random.randint(k7, (B, T), 0, 1000, dtype=jnp.int32)

    out = temporal_encoding(hour, day, month, days_since,
                            hour_tab, day_tab, month_tab, pe)
    out = jax.block_until_ready(out)
    assert out.shape == (B, T, E)

    # Exactness check vs a reference built from the same bf16-rounded tables
    # (the multi-hot gather/sum itself is exact; accumulation is f32).
    def bf16_rt(x):
        return x.astype(jnp.bfloat16).astype(jnp.float32)
    ref_cast = reference(hour, day, month, days_since,
                         bf16_rt(hour_tab), bf16_rt(day_tab),
                         bf16_rt(month_tab), bf16_rt(pe))
    assert jnp.allclose(out, ref_cast, atol=1e-4, rtol=1e-4), "gather/sum mismatch"

    # Loose check vs the full-f32 reference (bf16 table rounding ~0.4% rel).
    ref_f32 = reference(hour, day, month, days_since,
                        hour_tab, day_tab, month_tab, pe)
    assert jnp.allclose(out, ref_f32, atol=5e-2, rtol=5e-2), "mismatch vs f32 reference"

    print("KERNEL_OK")
</pallas_src>

<mosaic_0001>
module attributes {stable_mosaic.version = 11 : i64} {
  func.func @temporal_encoding_kernel(%arg0: i32, %arg1: memref<8x4xi32, #tpu.memory_space<vmem>>, %arg2: memref<512x32xbf16, #tpu.memory_space<vmem>>, %arg3: memref<8x32xf32, #tpu.memory_space<vmem>>) attributes {dimension_semantics = [#tpu.dimension_semantics<parallel>], iteration_bounds = array<i64: 2>, scalar_prefetch = 0 : i64, scratch_operands = 0 : i64, tpu.core_type = #tpu.core_type<tc>, window_params = [{transform_indices = @transform_0, window_bounds = array<i64: 8, 4>}, {pipeline_mode = #tpu.pipeline_mode<synchronous>, transform_indices = @transform_1, window_bounds = array<i64: 512, 32>}, {transform_indices = @transform_2, window_bounds = array<i64: 8, 32>}]} {
    %c0 = arith.constant 0 : index
    %c0_0 = arith.constant 0 : index
    %0 = vector.load %arg1[%c0, %c0_0] : memref<8x4xi32, #tpu.memory_space<vmem>>, vector<8x4xi32>
    %1 = tpu.iota {dimensions = array<i32: 1>} : vector<8x384xi32>
    %2 = vector.extract_strided_slice %0 {offsets = [0, 3], sizes = [8, 1], strides = [1, 1]} : vector<8x4xi32> to vector<8x1xi32>
    %3 = vector.broadcast %2 : vector<8x1xi32> to vector<8x384xi32>
    %4 = arith.cmpi eq, %3, %1 : vector<8x384xi32>
    %5 = tpu.iota {dimensions = array<i32: 1>} : vector<8x128xi32>
    %6 = vector.extract_strided_slice %0 {offsets = [0, 0], sizes = [8, 1], strides = [1, 1]} : vector<8x4xi32> to vector<8x1xi32>
    %7 = vector.broadcast %6 : vector<8x1xi32> to vector<8x128xi32>
    %8 = arith.cmpi eq, %7, %5 : vector<8x128xi32>
    %9 = vector.extract_strided_slice %0 {offsets = [0, 1], sizes = [8, 1], strides = [1, 1]} : vector<8x4xi32> to vector<8x1xi32>
    %10 = vector.broadcast %9 : vector<8x1xi32> to vector<8x128xi32>
    %11 = arith.cmpi eq, %10, %5 : vector<8x128xi32>
    %12 = arith.ori %8, %11 : vector<8x128xi1>
    %13 = vector.extract_strided_slice %0 {offsets = [0, 2], sizes = [8, 1], strides = [1, 1]} : vector<8x4xi32> to vector<8x1xi32>
    %14 = vector.broadcast %13 : vector<8x1xi32> to vector<8x128xi32>
    %15 = arith.cmpi eq, %14, %5 : vector<8x128xi32>
    %16 = arith.ori %12, %15 : vector<8x128xi1>
    %17 = arith.extui %4 : vector<8x384xi1> to vector<8x384xi32>
    %18 = arith.sitofp %17 : vector<8x384xi32> to vector<8x384xf32>
    %19 = arith.truncf %18 : vector<8x384xf32> to vector<8x384xbf16>
    %20 = arith.extui %16 : vector<8x128xi1> to vector<8x128xi32>
    %21 = arith.sitofp %20 : vector<8x128xi32> to vector<8x128xf32>
    %22 = arith.truncf %21 : vector<8x128xf32> to vector<8x128xbf16>
    %23 = tpu.concatenate %19, %22 in 1 : vector<8x384xbf16>, vector<8x128xbf16> -> vector<8x512xbf16>
    %c0_1 = arith.constant 0 : index
    %c0_2 = arith.constant 0 : index
    %24 = vector.load %arg2[%c0_1, %c0_2] : memref<512x32xbf16, #tpu.memory_space<vmem>>, vector<512x32xbf16>
    %cst = arith.constant dense<0.000000e+00> : vector<8x32xf32>
    %25 = tpu.matmul %23, %24, %cst {dimension_numbers = #tpu.dot_dimension_numbers<[1], [0], [0], [1], [0, 0, 1, 1], [], []>} : vector<8x512xbf16>, vector<512x32xbf16>, vector<8x32xf32> -> vector<8x32xf32>
    %c0_3 = arith.constant 0 : index
    %c0_4 = arith.constant 0 : index
    %26 = vector.load %arg3[%c0_3, %c0_4] : memref<8x32xf32, #tpu.memory_space<vmem>>, vector<8x32xf32>
    tpu.vector_store %arg3[%c0_3, %c0_4], %25 {strides = array<i32>} : memref<8x32xf32, #tpu.memory_space<vmem>>, vector<8x32xf32>,
    return
  }
  func.func @transform_0(%arg0: i32) -> (i32, i32) {
    %c0_i32 = arith.constant 0 : i32
    %c0_i32_0 = arith.constant 0 : i32
    return %arg0, %c0_i32 : i32, i32
  }
  func.func @transform_1(%arg0: i32) -> (i32, i32) {
    %c0_i32 = arith.constant 0 : i32
    %c0_i32_0 = arith.constant 0 : i32
    %c0_i32_1 = arith.constant 0 : i32
    return %c0_i32, %c0_i32_0 : i32, i32
  }
  func.func @transform_2(%arg0: i32) -> (i32, i32) {
    %c0_i32 = arith.constant 0 : i32
    %c0_i32_0 = arith.constant 0 : i32
    return %arg0, %c0_i32 : i32, i32
  }
}

</mosaic_0001>

<bundles_post_ra>
// kernel: tpu_custom_call.1
= control target key start
LH: loop header
LB: loop body
LE: loop exit
PB: predicated region body
PF: predicated region fallthrough
CT: control target
= control target key end

     0   :  { %7 = vsyncpa [#allocation3], 0  ;;  %s1039_s0 = inlined_call_operand.vmem [shape: s32[16,4], index: 0, kind: input, shape index: {}]   ;;  %s1040_s1 = inlined_call_operand.vmem [shape: bf16[512,32], index: 1, kind: input, shape index: {}]   ;;  %s1041_s2 = inlined_call_operand.hbm [shape: f32[16,32], index: 2, kind: output, shape index: {}]  }
   0x1   :  { %9 = vsyncpa [#allocation3 + $0x1], 0  ;;  %s850_s9 = smov 0   ;;  %s852_s10 = smov 0  }
   0x2   :  { %s854_s11 = smov 0   ;;  %s856_s12 = smov 0  }
   0x3 LB: > { %s871_s13 = sadd.s32 4294967295, %s827_s12   ;;  %s588_s14 = sadd.s32 4294967294, %s827_s12   ;;  %s827_s12 = sphi %s856_s12, %s1047_s12   ;;  %s823_s11 = sphi %s854_s11, %s1046_s11   ;;  %s819_s10 = sphi %s852_s10, %s1045_s10   ;;  %s815_s9 = sphi %s850_s9, %s1044_s9  }
   0x4   : > { %s875_s15 = sadd.s32 1, %s827_s12   ;;  %s69_s16 = sadd.s32 1, %s823_s11 }
   0x5   : > { %s66_s17 = ssub.s32 %s827_s12, %s875_s15  ;;  %p79_p0 = scmp.ne.s32.totalorder %s823_s11, %s819_s10 }
   0x6   : > { %p67_p1 = scmp.eq.s32.totalorder %s66_s17, 0  ;;  %p80_p2 = scmp.eq.s32.totalorder %s871_s13, 1 }
   0x7   : > { %p85_p3 = scmp.ne.s32.totalorder %s819_s10, %s815_s9  ;;  %p86_p4 = scmp.eq.s32.totalorder %s588_s14, 1 }
   0x8   : > { %s886_s18 = scalar_select %p67_p1, %s823_s11, %s69_s16  }
   0x9   : > { %p888_p5 = por %p80_p2, %p79_p0  ;;  %p892_p6 = por %p86_p4, %p85_p3 }
   0xa   : > { %p591_p7 = scmp.ge.s32.totalorder %s827_s12, 1  ;;  %p114_p8 = scmp.lt.s32.totalorder %s827_s12, 3 }
   0xc   : > { %p115_p9 = pnand %p591_p7, %p114_p8 }
   0xd   : > { %p135_p10 = scmp.lt.s32.totalorder (!%p115_p9), %s871_s13, 1  ;;  %s639_s7 = sshll.u32 (!%p115_p9), %s871_s13, 7 }
   0xe   : > { %118 = sbr.rel (%p115_p9) target bundleno = 373 (0x175), region = 28  ;;  %s1004_s21 = scalar_lea.hbm (!%p115_p9), %s1041_s2, %s639_s7 }
  0x13   : > { %v735_v0 = vld [vmem:[%s1040_s1 + $0x78] sm:$0xff]   ;;  %v829_v1 = vmov 2   ;;  %v830_v2 = vmov 0   ;;  %s136_s23 = scalar_select %p135_p10, %s871_s13, 1  ;;  %v739_v6 = vld [vmem:[%s1040_s1 + $0x70] sm:$0xff]   ;;  %v743_v11 = vld [vmem:[%s1040_s1 + $0x68] sm:$0xff]   ;;  %v141_v37 = vlaneseq }
  0x14   : > { %732 = vset.pattern.permute.xlu1 %v829_v1  ;;  %730 = vset.pattern.permute.xlu0 %v830_v2  ;;  %v736_v3 = vld [vmem:[%s1040_s1 + $0x38] sm:$0xff]   ;;  %v740_v8 = vld [vmem:[%s1040_s1 + $0x30] sm:$0xff]   ;;  %v744_v12 = vld [vmem:[%s1040_s1 + $0x28] sm:$0xff]   ;;  %v831_v13 = vmov 3   ;;  %v832_v14 = vmov 1   ;;  %vm513_vm12 = vcmask 261120  }
  0x15   : > { %642 = vmatprep.subr.bf16.mxu0 %v735_v0  ;;  %v737_v4 = vld [vmem:[%s1040_s1 + $0xf8] sm:$0xff]   ;;  %s593_s28 = sshll.u32 %s136_s23, 3  ;;  %v741_v9 = vld [vmem:[%s1040_s1 + $0xf0] sm:$0xff]   ;;  %v745_v15 = vld [vmem:[%s1040_s1 + $0xe8] sm:$0xff]   ;;  %v142_v38 = vand.u32 127, %v141_v37  ;;  %s834_s13 = smov [#allocation2]  }
  0x16   : > { %643 = vmatpush3.bf16.msra.mxu0 %v736_v3  ;;  %v738_v5 = vld [vmem:[%s1040_s1 + $0xb8] sm:$0xff]   ;;  %s138_s5 = scalar_lea.vmem %s1039_s0, %s593_s28  ;;  %664 = vmatprep.subr.bf16.mxu1 %v737_v4  ;;  %v742_v10 = vld [vmem:[%s1040_s1 + $0xb0] sm:$0xff]   ;;  %v746_v16 = vld [vmem:[%s1040_s1 + $0xa8] sm:$0xff]   ;;  %v833_v45 = vmov 1.0|1.0   ;;  %s771_s24 = sshll.u32 %s834_s13, 4  ;;  %s772_s24 = int_to_ptr.vmem [resolvable:$false] %s771_s24 }
  0x17   : > { %v140_v7 = vld [vmem:[%s138_s5] sm:$0xff]  ;;  %665 = vmatpush3.bf16.msra.mxu1 %v738_v5  ;;  %644 = vmatprep.subr.bf16.mxu0 %v739_v6  ;;  %v751_v21 = vld [vmem:[%s1040_s1 + $0x58] sm:$0xff]   ;;  %v755_v25 = vld [vmem:[%s1040_s1 + $0x50] sm:$0xff]   ;;  %v144_v41 = vadd.s32 256, %v142_v38  ;;  %v143_v42 = vadd.s32 128, %v142_v38  ;;  %s132_s5 = sand.u32 1, %s819_s10  }
  0x18   : > { %161 = vperm.xlu1 %732, %v140_v7   ;;  %152 = vperm.xlu0 %730, %v140_v7   ;;  %v747_v17 = vld [vmem:[%s1040_s1 + $0x60] sm:$0xff]   ;;  %v752_v22 = vld [vmem:[%s1040_s1 + $0x18] sm:$0xff]   ;;  %v756_v26 = vld [vmem:[%s1040_s1 + $0x10] sm:$0xff]   ;;  %s592_s6 = sshll.u32 %s132_s5, 3  ;;  %s516_s22 = scalar_lea.sflag [#allocation3], %s132_s5 }
  0x19   : > { %666 = vmatprep.subr.bf16.mxu1 %v741_v9  ;;  %v748_v18 = vld [vmem:[%s1040_s1 + $0x20] sm:$0xff]   ;;  %v753_v23 = vld [vmem:[%s1040_s1 + $0xd8] sm:$0xff]   ;;  %v757_v27 = vld [vmem:[%s1040_s1 + $0xd0] sm:$0xff]   ;;  %s134_s8 = scalar_lea.vmem [#allocation2], %s592_s6  ;;  %s773_s25 = scalar_lea.vmem %s772_s24, 256 }
  0x1a   : > { %645 = vmatpush3.bf16.msra.mxu0 %v740_v8  ;;  %v749_v19 = vld [vmem:[%s1040_s1 + $0xe0] sm:$0xff]   ;;  %v754_v24 = vld [vmem:[%s1040_s1 + $0x98] sm:$0xff]   ;;  %v758_v28 = vld [vmem:[%s1040_s1 + $0x90] sm:$0xff]   ;;  %s529_s14 = sshll.u32 %s134_s8, 4  ;;  %s530_s14 = int_to_ptr.vmem [resolvable:$true] %s529_s14 }
  0x1b   : > { %667 = vmatpush3.bf16.msra.mxu1 %v742_v10  ;;  %646 = vmatprep.subr.bf16.mxu0 %v743_v11  ;;  %v750_v20 = vld [vmem:[%s1040_s1 + $0xa0] sm:$0xff]   ;;  %v759_v29 = vld [vmem:[%s1040_s1 + $0x48] sm:$0xff]   ;;  %s767_s23 = scalar_lea.vmem %s530_s14, 128  ;;  %p774_p0 = scmp.lt.s32.totalorder %s530_s14, %s772_s24 }
  0x1c   : > { %733 = vset.pattern.permute.xlu1 %v831_v13  ;;  %731 = vset.pattern.permute.xlu0 %v832_v14  ;;  %v760_v30 = vld [vmem:[%s1040_s1 + $0x8] sm:$0xff]   ;;  %v763_v33 = vld [vmem:[%s1040_s1 + $0x40] sm:$0xff]   ;;  %p768_p11 = scmp.ne.s32.totalorder %s530_s14, %s767_s23  ;;  %p775_p1 = scmp.lt.s32.totalorder %s773_s25, %s767_s23 }
  0x1d   : > { %146 = vperm.xlu1 %733, %v140_v7   ;;  %156 = vperm.xlu0 %731, %v140_v7   ;;  %v761_v31 = vld [vmem:[%s1040_s1 + $0xc8] sm:$0xff]   ;;  %v764_v34 = vld [vmem:[%s1040_s1] sm:$0xff]  }
  0x1e   : > { %668 = vmatprep.subr.bf16.mxu1 %v745_v15  ;;  %647 = vmatpush3.bf16.msra.mxu0 %v744_v12  ;;  %v762_v32 = vld [vmem:[%s1040_s1 + $0x88] sm:$0xff]   ;;  %v765_v35 = vld [vmem:[%s1040_s1 + $0xc0] sm:$0xff]   ;;  %p769_p12 = pnand %p768_p11, %p888_p5  ;;  %p776_p2 = por %p775_p1, %p774_p0 }
  0x1f   : > { %669 = vmatpush3.bf16.msra.mxu1 %v746_v16  ;;  %648 = vmatprep.subr.bf16.mxu0 %v747_v17  ;;  %v766_v36 = vld [vmem:[%s1040_s1 + $0x80] sm:$0xff]  }
  0x20   : > { %670 = vmatprep.subr.bf16.mxu1 %v749_v19  ;;  %p770_p13 = pneg %p769_p12 }
  0x21   : > { %734 = vset.pattern.permute.xlu0 %v829_v1 }
  0x22   : > { %649 = vmatpush3.bf16.msra.mxu0 %v748_v18  ;;  %p777_p3 = pnand %p776_p2, %p770_p13 }
  0x23   : > { %671 = vmatpush3.bf16.msra.mxu1 %v750_v20  ;;  %650 = vmatprep.subr.bf16.mxu0 %v751_v21 }
  0x24   : > { %672 = vmatprep.subr.bf16.mxu1 %v753_v23 }
  0x26   : > { %651 = vmatpush3.bf16.msra.mxu0 %v752_v22 }
  0x27   : > { %673 = vmatpush3.bf16.msra.mxu1 %v754_v24  ;;  %652 = vmatprep.subr.bf16.mxu0 %v755_v25 }
  0x28   : > { %674 = vmatprep.subr.bf16.mxu1 %v757_v27 }
  0x2a   : > { %653 = vmatpush3.bf16.msra.mxu0 %v756_v26 }
  0x2b   : > { %675 = vmatpush3.bf16.msra.mxu1 %v758_v28  ;;  %654 = vmatprep.subr.bf16.mxu0 %v759_v29 }
  0x2c   : > { %676 = vmatprep.subr.bf16.mxu1 %v761_v31 }
  0x2e   : > { %655 = vmatpush3.bf16.msra.mxu0 %v760_v30 }
  0x2f   : > { %677 = vmatpush3.bf16.msra.mxu1 %v762_v32  ;;  %656 = vmatprep.subr.bf16.mxu0 %v763_v33 }
  0x30   : > { %678 = vmatprep.subr.bf16.mxu1 %v765_v35 }
  0x32   : > { %657 = vmatpush3.bf16.msra.mxu0 %v764_v34 }
  0x33   : > { %679 = vmatpush3.bf16.msra.mxu1 %v766_v36 }
  0x93   : > { %v153_v39 = vpop.permute.xlu0 %152  ;;  %v162_v40 = vpop.permute.xlu1 %161 }
  0x94   : > { %vm154_vm5 = vcmp.eq.s32.totalorder %v153_v39, %v142_v38  ;;  %vm163_vm8 = vcmp.eq.s32.totalorder %v162_v40, %v142_v38 }
  0x98   : > { %v147_v43 = vpop.permute.xlu1 %146  ;;  %v157_v44 = vpop.permute.xlu0 %156 }
  0x99   : > { %vm148_vm0 = vcmp.eq.s32.totalorder %v147_v43, %v142_v38  ;;  %vm150_vm1 = vcmp.eq.s32.totalorder %v147_v43, %v144_v41  ;;  %vm158_vm2 = vcmp.eq.s32.totalorder %v157_v44, %v142_v38  ;;  %vm149_vm4 = vcmp.eq.s32.totalorder %v147_v43, %v143_v42 }
  0x9a   : > { %vm632_vm3 = vmpackc.low %vm148_vm0, %vm148_vm0 }
  0x9b   : > { %vm636_vm6 = vmpackc.low %vm150_vm1, %vm150_vm1 }
  0x9c   : > { %vm159_vm7 = vmor %vm154_vm5, %vm158_vm2 }
  0x9d   : > { %vm630_vm9 = vmpackc.low %vm149_vm4, %vm149_vm4 }
  0x9e   : > { %631 = vmatprep.mubr.msk.bf16.mxu0 %vm630_vm9, %v833_v45  ;;  %vm164_vm10 = vmor %vm159_vm7, %vm163_vm8 }
  0x9f   : > { %633 = vmatmul.mubr.msk.bf16.vlgmr.msra.gmra.mxu0 %vm632_vm3, %v833_v45  ;;  %vm634_vm11 = vmpackc.low %vm164_vm10, %vm164_vm10 }
  0xa0   : > { %635 = vmatprep.mubr.msk.bf16.mxu1 %vm634_vm11, %v833_v45 }
  0xa1   : > { %637 = vmatmul.mubr.msk.bf16.vlgmr.msra.gmra.mxu1 %vm636_vm6, %v833_v45 }
 0x15f   : > { %v658_v46 = vpop.f32.mrf.mxu0 }
 0x161   : > { %v659_v47 = vpop.f32.mrf.mxu0  ;;  %v680_v48 = vpop.f32.mrf.mxu1 }
 0x162   : > { %v660_v51 = vadd.f32 %v659_v47, %v658_v46 }
 0x163   : > { %v661_v49 = vpop.f32.mrf.mxu0  ;;  %v681_v50 = vpop.f32.mrf.mxu1 }
 0x164   : > { %v682_v52 = vadd.f32 %v681_v50, %v680_v48 }
 0x165   : > { %v662_v53 = vpop.f32.mrf.mxu0  ;;  %v683_v54 = vpop.f32.mrf.mxu1 }
 0x166   : > { %v508_v55 = vadd.f32 %v682_v52, %v660_v51 }
 0x167   : > { %v684_v56 = vpop.f32.mrf.mxu1 }
 0x168   : > { %514 = vst.msk [vmem:[%s134_s8] sm:$0xff] %vm513_vm12, %v508_v55 }
 0x169   : > { %780 = shalt.err (!%p777_p3)
}
 0x16a   : > { %s781_s26 = scalar_lea.hbm %s1004_s21, 128  ;;  %s785_s29 = scalar_lea.hbm %s1041_s2, 256 }
 0x16b   : > { %p782_p4 = scmp.ne.s32.totalorder %s1004_s21, %s781_s26  ;;  %p786_p9 = scmp.lt.s32.totalorder %s1004_s21, %s1041_s2 }
 0x16c   : > { %p787_p10 = scmp.lt.s32.totalorder %s785_s29, %s781_s26 }
 0x16d   : > { %p783_p7 = pnand %p782_p4, %p888_p5 }
 0x16e   : > { %p788_p11 = por %p787_p10, %p786_p9 }
 0x16f   : > { %p784_p8 = pneg %p783_p7 }
 0x171   : > { %p789_p12 = pnand %p788_p11, %p784_p8 }
 0x173   : > { %792 = shalt.err (!%p789_p12)
}
 0x174   : > { %686 = dma.vmem_to_hbm [thread:$0]  (%p888_p5), %s530_s14, 128, %s1004_s21, %s516_s22  }
 0x175 PF: > { %p692_p13 = scmp.ge.s32.totalorder %s827_s12, 2  ;;  %s541_s4 = sand.u32 1, %s815_s9  }
 0x176   : > { %s542_s5 = scalar_lea.sflag [#allocation3], %s541_s4 }
 0x177   : > { %p689_p0 = pnand %p692_p13, %p892_p6 }
 0x179   : > { %p690_p1 = pneg %p689_p0 }
 0x17b   : > { %810 = dma.done.wait (%p690_p1), %s542_s5, 128  }
 0x17c   : > { %812 = vsyncadd (%p690_p1), %s542_s5, 4294967168  ;;  %p12_p2 = scmp.ge.s32.totalorder %s875_s15, 4   ;;  %s1044_s9 = smov %s819_s10 }
 0x17d   : > { %s1045_s10 = smov %s823_s11  ;;  %s1046_s11 = smov %s886_s18 }
 0x17e   : > { %s1047_s12 = smov %s875_s15  ;;  %14 = sbr.rel (!%p12_p2) target bundleno = 3 (0x3), region = 63 }
 0x183   :  { %547 = vsyncpa [#allocation3], 1 }
 0x184   :  { %549 = vsyncpa [#allocation3 + $0x1], 1 }

</bundles_post_ra>
